<compile_context>
chip_gen: v5e
topology: v5e:2x2
jax: 0.10.0
libtpu: 0.0.40
codegen_flags: <defaults>
</compile_context>

<pallas_src>
import jax
import jax.numpy as jnp
from jax import lax
from jax.experimental import pallas as pl
from jax.experimental.pallas import tpu as pltpu

_LANE = 128
_SUBLANE = 8
_ROW_TILE = 256   # target tile for s rows (output sublane dim)
_COL_TILE = 256   # target tile for t rows (output lane dim)
_VMEM_LIMIT = 32 << 20


def _round_up(x, m):
    return (x + m - 1) // m * m


def _pick_tile(n, target):
    """Return (tile, padded_n) with padded_n % tile == 0 and tile <= target."""
    if n <= target:
        return n, n
    return target, _round_up(n, target)


def _proj_kernel(x_ref, w_ref, b_ref, h_ref):
    # h = tanh(x @ W.T + b).  W is kept in PyTorch (out, in) layout; contracting
    # dim 1 of both operands is exactly x @ W.T with no transpose materialized.
    acc = lax.dot_general(
        x_ref[...], w_ref[...],
        dimension_numbers=(((1,), (1,)), ((), ())),
        preferred_element_type=jnp.float32,
    )
    h_ref[...] = jnp.tanh(acc + b_ref[...]).astype(h_ref.dtype)


def _sim_kernel(sh_ref, th_ref, o_ref):
    # out = s_h @ t_h.T, expressed as a contraction over the shared last dim
    # so no XLU transpose of t_h is needed.
    o_ref[...] = lax.dot_general(
        sh_ref[...], th_ref[...],
        dimension_numbers=(((1,), (1,)), ((), ())),
        preferred_element_type=jnp.float32,
    )


def _project(x_pad, w_pad, b_pad, row_tile):
    """tanh(x @ W.T + b), row-tiled; returns bf16 activations."""
    rp, dp = x_pad.shape
    return pl.pallas_call(
        _proj_kernel,
        out_shape=jax.ShapeDtypeStruct((rp, dp), jnp.bfloat16),
        grid_spec=pltpu.PrefetchScalarGridSpec(
            num_scalar_prefetch=0,
            grid=(rp // row_tile,),
            in_specs=[
                pl.BlockSpec((row_tile, dp), lambda i: (i, 0)),
                pl.BlockSpec((dp, dp), lambda i: (0, 0)),
                pl.BlockSpec((1, dp), lambda i: (0, 0)),
            ],
            out_specs=pl.BlockSpec((row_tile, dp), lambda i: (i, 0)),
        ),
        compiler_params=pltpu.CompilerParams(
            dimension_semantics=("parallel",),
            vmem_limit_bytes=_VMEM_LIMIT,
        ),
    )(x_pad, w_pad, b_pad)


def _similarity(s_h, t_h, tm, tn):
    np_, dp = s_h.shape
    mp, _ = t_h.shape
    return pl.pallas_call(
        _sim_kernel,
        out_shape=jax.ShapeDtypeStruct((np_, mp), jnp.float32),
        grid_spec=pltpu.PrefetchScalarGridSpec(
            num_scalar_prefetch=0,
            grid=(np_ // tm, mp // tn),
            in_specs=[
                pl.BlockSpec((tm, dp), lambda i, j: (i, 0)),
                pl.BlockSpec((tn, dp), lambda i, j: (j, 0)),
            ],
            out_specs=pl.BlockSpec((tm, tn), lambda i, j: (i, j)),
        ),
        compiler_params=pltpu.CompilerParams(
            dimension_semantics=("parallel", "parallel"),
            vmem_limit_bytes=_VMEM_LIMIT,
        ),
    )(s_h, t_h)


def matcher_forward(s, t, w, b):
    """Pallas equivalent of Matcher.forward(s, t, infer=False).

    s: (N, D), t: (M, D), w: (D, D) PyTorch Linear weight (out, in), b: (D,).
    Returns the (N, M) similarity matrix tanh(sW.T+b) @ tanh(tW.T+b).T in f32.
    """
    N, D = s.shape
    M, _ = t.shape

    # 128-align the contraction dim and output lanes; 8-align output sublanes.
    dp = _round_up(D, _LANE)
    np0 = _round_up(N, _SUBLANE)
    mp0 = _round_up(M, _LANE)          # lane-dense output columns (>= 128)
    tm, np_ = _pick_tile(np0, _ROW_TILE)
    tn, mp = _pick_tile(mp0, _COL_TILE)

    # Zero padding is exact: padded embedding columns contribute 0 to every dot
    # product; padded rows only land in output rows/cols that get sliced away.
    s_pad = jnp.zeros((np_, dp), jnp.bfloat16).at[:N, :D].set(s.astype(jnp.bfloat16))
    t_pad = jnp.zeros((mp, dp), jnp.bfloat16).at[:M, :D].set(t.astype(jnp.bfloat16))
    w_pad = jnp.zeros((dp, dp), jnp.bfloat16).at[:D, :D].set(w.astype(jnp.bfloat16))
    b_pad = jnp.zeros((1, dp), jnp.float32).at[0, :D].set(b.astype(jnp.float32))

    # Stage 1: hoisted projections (each computed exactly once).
    s_h = _project(s_pad, w_pad, b_pad, tm)
    t_h = _project(t_pad, w_pad, b_pad, tn)

    # Stage 2: tiled similarity matmul (bf16 operands, f32 accumulation).
    out = _similarity(s_h, t_h, tm, tn)
    return out[:N, :M]


# TODO(synk): the `infer=True` branch of the PyTorch forward calls
# `sum(-1).sigmoid()` on a bare comma expression, which raises at runtime in
# the reference module; only the training / torch.mm path is implemented here.


def _reference(s, t, w, b):
    # Reference uses bf16-rounded matmul operands (same quantization the kernel
    # applies) with f32 math everywhere else.
    s_b = s.astype(jnp.bfloat16).astype(jnp.float32)
    t_b = t.astype(jnp.bfloat16).astype(jnp.float32)
    w_b = w.astype(jnp.bfloat16).astype(jnp.float32)
    s_h = jnp.tanh(s_b @ w_b.T + b)
    t_h = jnp.tanh(t_b @ w_b.T + b)
    return s_h @ t_h.T


if __name__ == "__main__":
    key = jax.random.PRNGKey(0)

    # Case 1: tiny shapes matching the module's toy usage (N=M=8, D=32).
    embedding_dim = 32
    N, M = 8, 8
    k_s, k_t, k_w, k_b, key = jax.random.split(key, 5)
    s = jax.random.normal(k_s, (N, embedding_dim), dtype=jnp.float32)
    t = jax.random.normal(k_t, (M, embedding_dim), dtype=jnp.float32)
    w = jax.random.normal(k_w, (embedding_dim, embedding_dim), dtype=jnp.float32) * 0.1
    b = jax.random.normal(k_b, (embedding_dim,), dtype=jnp.float32) * 0.1

    out = jax.block_until_ready(matcher_forward(s, t, w, b))
    ref = _reference(s, t, w, b)
    assert out.shape == (N, M)
    assert jnp.allclose(out, ref, atol=1e-1, rtol=5e-2), "mismatch vs reference (small)"

    # Case 2: ragged shapes that exercise padding and the 2-D tiled grid.
    D2, N2, M2 = 96, 300, 260
    k_s, k_t, k_w, k_b, key = jax.random.split(key, 5)
    s2 = jax.random.normal(k_s, (N2, D2), dtype=jnp.float32)
    t2 = jax.random.normal(k_t, (M2, D2), dtype=jnp.float32)
    w2 = jax.random.normal(k_w, (D2, D2), dtype=jnp.float32) * 0.1
    b2 = jax.random.normal(k_b, (D2,), dtype=jnp.float32) * 0.1

    out2 = jax.block_until_ready(matcher_forward(s2, t2, w2, b2))
    ref2 = _reference(s2, t2, w2, b2)
    assert out2.shape == (N2, M2)
    assert jnp.allclose(out2, ref2, atol=1e-1, rtol=5e-2), "mismatch vs reference (tiled)"

    print("KERNEL_OK")
</pallas_src>

<mosaic_0001>
module attributes {stable_mosaic.version = 11 : i64} {
  func.func @_proj_kernel(%arg0: i32, %arg1: memref<8x128xbf16, #tpu.memory_space<vmem>>, %arg2: memref<128x128xbf16, #tpu.memory_space<vmem>>, %arg3: memref<1x128xf32, #tpu.memory_space<vmem>>, %arg4: memref<8x128xbf16, #tpu.memory_space<vmem>>) attributes {dimension_semantics = [#tpu.dimension_semantics<parallel>], iteration_bounds = array<i64: 1>, scalar_prefetch = 0 : i64, scratch_operands = 0 : i64, tpu.core_type = #tpu.core_type<tc>, window_params = [{transform_indices = @transform_0, window_bounds = array<i64: 8, 128>}, {pipeline_mode = #tpu.pipeline_mode<synchronous>, transform_indices = @transform_1, window_bounds = array<i64: 128, 128>}, {pipeline_mode = #tpu.pipeline_mode<synchronous>, transform_indices = @transform_2, window_bounds = array<i64: 1, 128>}, {transform_indices = @transform_3, window_bounds = array<i64: 8, 128>}]} {
    %c0 = arith.constant 0 : index
    %c0_0 = arith.constant 0 : index
    %0 = vector.load %arg1[%c0, %c0_0] : memref<8x128xbf16, #tpu.memory_space<vmem>>, vector<8x128xbf16>
    %c0_1 = arith.constant 0 : index
    %c0_2 = arith.constant 0 : index
    %1 = vector.load %arg2[%c0_1, %c0_2] : memref<128x128xbf16, #tpu.memory_space<vmem>>, vector<128x128xbf16>
    %cst = arith.constant dense<0.000000e+00> : vector<8x128xf32>
    %2 = tpu.matmul %0, %1, %cst {dimension_numbers = #tpu.dot_dimension_numbers<[1], [1], [0], [0], [0, 0, 1, 0], [], []>} : vector<8x128xbf16>, vector<128x128xbf16>, vector<8x128xf32> -> vector<8x128xf32>
    %c0_3 = arith.constant 0 : index
    %c0_4 = arith.constant 0 : index
    %3 = vector.load %arg3[%c0_3, %c0_4] : memref<1x128xf32, #tpu.memory_space<vmem>>, vector<1x128xf32>
    %4 = vector.broadcast %3 : vector<1x128xf32> to vector<8x128xf32>
    %5 = arith.addf %2, %4 : vector<8x128xf32>
    %6 = math.tanh %5 : vector<8x128xf32>
    %7 = arith.truncf %6 : vector<8x128xf32> to vector<8x128xbf16>
    %c0_5 = arith.constant 0 : index
    %c0_6 = arith.constant 0 : index
    %8 = vector.load %arg4[%c0_5, %c0_6] : memref<8x128xbf16, #tpu.memory_space<vmem>>, vector<8x128xbf16>
    tpu.vector_store %arg4[%c0_5, %c0_6], %7 {strides = array<i32>} : memref<8x128xbf16, #tpu.memory_space<vmem>>, vector<8x128xbf16>,
    return
  }
  func.func @transform_0(%arg0: i32) -> (i32, i32) {
    %c0_i32 = arith.constant 0 : i32
    %c0_i32_0 = arith.constant 0 : i32
    return %arg0, %c0_i32 : i32, i32
  }
  func.func @transform_1(%arg0: i32) -> (i32, i32) {
    %c0_i32 = arith.constant 0 : i32
    %c0_i32_0 = arith.constant 0 : i32
    %c0_i32_1 = arith.constant 0 : i32
    return %c0_i32, %c0_i32_0 : i32, i32
  }
  func.func @transform_2(%arg0: i32) -> (i32, i32) {
    %c0_i32 = arith.constant 0 : i32
    %c0_i32_0 = arith.constant 0 : i32
    %c0_i32_1 = arith.constant 0 : i32
    return %c0_i32, %c0_i32_0 : i32, i32
  }
  func.func @transform_3(%arg0: i32) -> (i32, i32) {
    %c0_i32 = arith.constant 0 : i32
    %c0_i32_0 = arith.constant 0 : i32
    return %arg0, %c0_i32 : i32, i32
  }
}

</mosaic_0001>

<bundles_post_ra>
// kernel: tpu_custom_call.1
= control target key start
LH: loop header
LB: loop body
LE: loop exit
PB: predicated region body
PF: predicated region fallthrough
CT: control target
= control target key end

     0   :  { %8 = vsyncpa [#allocation3], 0  ;;  %s311_s0 = inlined_call_operand.hbm [shape: bf16[8,128], index: 0, kind: input, shape index: {}]   ;;  %s312_s1 = inlined_call_operand.hbm [shape: bf16[128,128], index: 1, kind: input, shape index: {}]   ;;  %s313_s2 = inlined_call_operand.vmem [shape: f32[1,128], index: 2, kind: input, shape index: {}]   ;;  %s314_s3 = inlined_call_operand.hbm [shape: bf16[8,128], index: 3, kind: output, shape index: {}]  }
   0x1   :  { %9 = vsyncpa [#allocation6], 0 }
   0x2   :  { %10 = vsyncpa [#allocation4], 0  ;;  %s16_s14 = sshll.u32 %s311_s0, 4  ;;  %s274_s15 = smov [#allocation2]   ;;  %s17_s14 = int_to_ptr.hbm [resolvable:$true] %s16_s14 }
   0x3   :  { %s18_s16 = sshll.u32 %s274_s15, 4  ;;  %s26_s19 = sshll.u32 %s312_s1, 4  ;;  %s19_s16 = int_to_ptr.vmem [resolvable:$true] %s18_s16  ;;  %s27_s19 = int_to_ptr.hbm [resolvable:$true] %s26_s19 }
   0x4   :  { %21 = dma.hbm_to_vmem [thread:$0]  %s17_s14, 64, %s19_s16, [#allocation3]  }
   0x5   :  { %s275_s20 = smov [#allocation5]   ;;  %s276_s22 = smov 64  }
   0x6   :  { %s28_s21 = sshll.u32 %s275_s20, 4  ;;  %s277_s23 = smov 4   ;;  %s29_s21 = int_to_ptr.vmem [resolvable:$true] %s28_s21 }
   0x7   :  { %34 = dma.hbm_to_vmem [thread:$0]  %s27_s19, 1024, %s29_s21, [#allocation6], %s276_s22, %s276_s22, %s277_s23  }
   0x8   :  { %268 = dma.done.wait [#allocation3], 64  }
   0x9   :  { %269 = vsyncadd [#allocation3], 4294967232 }
   0xa   :  { %270 = dma.done.wait [#allocation6], 1024  }
   0xb   :  { %271 = vsyncadd [#allocation6], 4294966272  ;;  %v187_v0 = vld [vmem:[#allocation5 + $0x38] sm:$0xff]  ;;  %v186_v1 = vld [vmem:[#allocation5 + $0x30] sm:$0xff]  ;;  %s278_s24 = smov [#allocation7]   ;;  %s137_s28 = sshll.u32 %s314_s3, 4  ;;  %s138_s28 = int_to_ptr.hbm [resolvable:$true] %s137_s28 }
   0xc   :  { %114 = vmatpush.bf16.xpose.msra.mxu0 %v187_v0  ;;  %v185_v2 = vld [vmem:[#allocation5 + $0x28] sm:$0xff]  ;;  %v184_v3 = vld [vmem:[#allocation5 + $0x20] sm:$0xff]  ;;  %v183_v4 = vld [vmem:[#allocation5 + $0x18] sm:$0xff]  ;;  %s135_s25 = sshll.u32 %s278_s24, 4  ;;  %s136_s25 = int_to_ptr.vmem [resolvable:$true] %s135_s25 }
   0xd   :  { %v182_v5 = vld [vmem:[#allocation5 + $0x10] sm:$0xff]  ;;  %v181_v6 = vld [vmem:[#allocation5 + $0x8] sm:$0xff]  ;;  %v180_v7 = vld [vmem:[#allocation5] sm:$0xff] }
   0xe   :  { %v45_v8 = vld [vmem:[#allocation2] sm:$0xf] }
   0xf   :  { %v193_v9 = vld [vmem:[%s313_s2] ss:$0 sm:$0xff] }
  0x14   :  { %115 = vmatpush.bf16.xpose.msra.mxu0 %v186_v1 }
  0x1c   :  { %116 = vmatpush.bf16.xpose.msra.mxu0 %v185_v2 }
  0x24   :  { %117 = vmatpush.bf16.xpose.msra.mxu0 %v184_v3 }
  0x2c   :  { %118 = vmatpush.bf16.xpose.msra.mxu0 %v183_v4 }
  0x34   :  { %119 = vmatpush.bf16.xpose.msra.mxu0 %v182_v5 }
  0x3c   :  { %120 = vmatpush.bf16.xpose.msra.mxu0 %v181_v6 }
  0x44   :  { %121 = vmatpush.bf16.xpose.msra.mxu0 %v180_v7 }
  0x4b   :  { %122 = vmatmul.bf16.vlgmr.msra.gmra.mxu0 %v45_v8 }
  0xc8   :  { %v123_v10 = vpop.f32.mrf.mxu0 }
  0xc9   :  { %v124_v11 = vadd.f32 %v193_v9, %v123_v10 }
  0xcb   :  { %194 = vtanh.f32 %v124_v11 }
  0xd0   :  { %v125_v12 = vpop.f32.mrf.mxu0 }
  0xd1   :  { %v195_v13 = vpop.eup %194 }
  0xd2   :  { %v128_v14 = vpack.c.bf16 %v195_v13, %v195_v13 }
  0xd4   :  { %129 = vst [vmem:[#allocation7] sm:$0xf] %v128_v14 }
  0xd5   :  { %140 = dma.vmem_to_hbm [thread:$0]  %s136_s25, 64, %s138_s28, [#allocation4]  }
  0xd6   :  { %272 = dma.done.wait [#allocation4], 64  }
  0xd7   :  { %273 = vsyncadd [#allocation4], 4294967232 }
  0xd8   :  { %145 = vsyncpa [#allocation3], 1 }
  0xd9   :  { %146 = vsyncpa [#allocation6], 1 }
  0xda   :  { %147 = vsyncpa [#allocation4], 1 }

</bundles_post_ra>
